<compile_context>
chip_gen: v5e
topology: v5e:2x2
jax: 0.10.0
libtpu: 0.0.40
codegen_flags: <defaults>
</compile_context>

<pallas_src>
import functools

import jax
import jax.numpy as jnp
from jax import lax
from jax.experimental import pallas as pl
from jax.experimental.pallas import tpu as pltpu

_EPS = 1e-5                       # nn.LayerNorm default
_VMEM_LIMIT = 48 * 1024 * 1024    # fits v7x (64 MiB/TC); plenty on v5e/v6e
_RESIDENT_W_BYTES = 16 * 1024 * 1024   # bf16 W kept fully VMEM-resident below this


def _round_up(x, m):
    return (x + m - 1) // m * m


# --------------------------- LayerNorm (row-tiled) ---------------------------
def _layernorm_kernel(x_ref, g_ref, b_ref, o_ref, *, d_valid):
    # x_ref: (TM, D); g_ref/b_ref: (1, D).  Single-pass sum / sum-of-squares
    # over the full (unpadded) feature axis, all in fp32.
    x = x_ref[...].astype(jnp.float32)
    s = jnp.sum(x, axis=-1, keepdims=True)
    ss = jnp.sum(x * x, axis=-1, keepdims=True)
    mean = s * (1.0 / d_valid)
    var = jnp.maximum(ss * (1.0 / d_valid) - mean * mean, 0.0)  # biased var
    inv = lax.rsqrt(var + _EPS)
    y = (x - mean) * inv * g_ref[...].astype(jnp.float32) \
        + b_ref[...].astype(jnp.float32)
    o_ref[...] = y.astype(o_ref.dtype)


def layernorm_pallas(x2d, gamma, beta, *, tm=512):
    """x2d: (R, D); gamma/beta: (D,). Normalizes over the last axis.
    Ragged last row tile is handled by Pallas (masked stores); no padding.
    NOTE: if D is not a multiple of 128 the stores are lane-masked (perf only,
    still correct); ViT dims (768/1024) are already lane-dense."""
    R, D = x2d.shape
    TM = min(tm, _round_up(R, 8))

    kernel = functools.partial(_layernorm_kernel, d_valid=float(D))
    return pl.pallas_call(
        kernel,
        out_shape=jax.ShapeDtypeStruct((R, D), x2d.dtype),
        grid_spec=pltpu.PrefetchScalarGridSpec(
            num_scalar_prefetch=0,
            grid=(pl.cdiv(R, TM),),
            in_specs=[
                pl.BlockSpec((TM, D), lambda i: (i, 0)),
                pl.BlockSpec((1, D), lambda i: (0, 0)),
                pl.BlockSpec((1, D), lambda i: (0, 0)),
            ],
            out_specs=pl.BlockSpec((TM, D), lambda i: (i, 0)),
        ),
        compiler_params=pltpu.CompilerParams(
            dimension_semantics=("parallel",),
            vmem_limit_bytes=_VMEM_LIMIT),
    )(x2d, gamma.reshape(1, D), beta.reshape(1, D))


# ----------------------------- Column tile choice -----------------------------
def _pick_tn(D, F, tn):
    """Resident W (TN=F) when the bf16 weight fits the VMEM budget; otherwise a
    256-multiple column tile (MXU-friendly on v6e/v7x, 128-aligned for v5e)."""
    if tn is not None:
        return min(tn, F)
    if D * F * 2 <= _RESIDENT_W_BYTES:
        return F
    tn = (_RESIDENT_W_BYTES // (2 * D * 2)) // 256 * 256   # 2x for double-buffer
    return max(256, min(tn, _round_up(F, 256)))


# ------------------------- Linear (tiled, standalone) -------------------------
def _linear_kernel(x_ref, w_ref, b_ref, o_ref):
    # bf16 operands on the MXU, fp32 accumulation.
    acc = jnp.dot(x_ref[...].astype(jnp.bfloat16), w_ref[...],
                  preferred_element_type=jnp.float32)
    o_ref[...] = (acc + b_ref[...].astype(jnp.float32)).astype(o_ref.dtype)


def linear_pallas(x2d, w_bf16, b, *, tm=256, tn=None):
    """x2d: (R, D), w_bf16: (D, F) already cast to bf16, b: (F,)."""
    R, D = x2d.shape
    F = w_bf16.shape[1]
    TM = min(tm, _round_up(R, 8))
    TN = _pick_tn(D, F, tn)

    return pl.pallas_call(
        _linear_kernel,
        out_shape=jax.ShapeDtypeStruct((R, F), x2d.dtype),
        grid_spec=pltpu.PrefetchScalarGridSpec(
            num_scalar_prefetch=0,
            grid=(pl.cdiv(R, TM), pl.cdiv(F, TN)),
            in_specs=[
                pl.BlockSpec((TM, D), lambda i, j: (i, 0)),
                pl.BlockSpec((D, TN), lambda i, j: (0, j)),   # W: no i dep
                pl.BlockSpec((1, TN), lambda i, j: (0, j)),
            ],
            out_specs=pl.BlockSpec((TM, TN), lambda i, j: (i, j)),
        ),
        compiler_params=pltpu.CompilerParams(
            dimension_semantics=("parallel", "arbitrary"),
            vmem_limit_bytes=_VMEM_LIMIT),
    )(x2d, w_bf16, b.reshape(1, F))


# ----------------------- Fused LayerNorm + Linear kernel -----------------------
def _prenorm_linear_kernel(x_ref, g_ref, b_ref, w_ref, bias_ref, o_ref,
                           normed_ref, *, d_valid):
    # grid = (row tiles i, out-column tiles j); j is the inner, sequential axis.
    # LayerNorm runs once per row tile (j == 0) into a bf16 VMEM scratch; every
    # j reuses the cached normed tile and feeds the MXU directly (bf16 x bf16,
    # fp32 accumulation) — normalized activations never touch HBM.
    j = pl.program_id(1)

    @pl.when(j == 0)
    def _():
        x = x_ref[...].astype(jnp.float32)
        s = jnp.sum(x, axis=-1, keepdims=True)
        ss = jnp.sum(x * x, axis=-1, keepdims=True)
        mean = s * (1.0 / d_valid)
        var = jnp.maximum(ss * (1.0 / d_valid) - mean * mean, 0.0)
        inv = lax.rsqrt(var + _EPS)
        y = (x - mean) * inv * g_ref[...].astype(jnp.float32) \
            + b_ref[...].astype(jnp.float32)
        normed_ref[...] = y.astype(jnp.bfloat16)

    acc = jnp.dot(normed_ref[...], w_ref[...],
                  preferred_element_type=jnp.float32)
    o_ref[...] = (acc + bias_ref[...].astype(jnp.float32)).astype(o_ref.dtype)


def prenorm_linear_pallas(x2d, gamma, beta, w_bf16, bias, *, tm=256, tn=None):
    """Fused LayerNorm(x2d) @ w + bias.  x2d: (R, D), w_bf16: (D, F) bf16."""
    R, D = x2d.shape
    F = w_bf16.shape[1]
    TM = min(tm, _round_up(R, 8))
    TN = _pick_tn(D, F, tn)

    kernel = functools.partial(_prenorm_linear_kernel, d_valid=float(D))
    return pl.pallas_call(
        kernel,
        out_shape=jax.ShapeDtypeStruct((R, F), x2d.dtype),
        grid_spec=pltpu.PrefetchScalarGridSpec(
            num_scalar_prefetch=0,
            grid=(pl.cdiv(R, TM), pl.cdiv(F, TN)),
            in_specs=[
                pl.BlockSpec((TM, D), lambda i, j: (i, 0)),   # x: row tile
                pl.BlockSpec((1, D), lambda i, j: (0, 0)),    # gamma resident
                pl.BlockSpec((1, D), lambda i, j: (0, 0)),    # beta resident
                pl.BlockSpec((D, TN), lambda i, j: (0, j)),   # W: no i dep ->
                pl.BlockSpec((1, TN), lambda i, j: (0, j)),   #   VMEM-resident when TN=F
            ],
            out_specs=pl.BlockSpec((TM, TN), lambda i, j: (i, j)),
            scratch_shapes=[pltpu.VMEM((TM, D), jnp.bfloat16)],
        ),
        compiler_params=pltpu.CompilerParams(
            # rows parallel (megacore); columns must stay sequential per row
            # tile so j==0 (LN into scratch) runs before j>0 on the same core.
            dimension_semantics=("parallel", "arbitrary"),
            vmem_limit_bytes=_VMEM_LIMIT),
    )(x2d, gamma.reshape(1, D), beta.reshape(1, D), w_bf16, bias.reshape(1, F))


# --------------------------------- Modules ---------------------------------
class PallasLinear:
    """Linear(D -> F) backed by the tiled Pallas matmul kernel."""

    def __init__(self, weight, bias):
        self.weight = weight                              # (D, F) fp32 master
        self.weight_bf16 = weight.astype(jnp.bfloat16)    # cast ONCE for the MXU
        self.bias = bias                                  # (F,)

    def __call__(self, x):
        B, N, D = x.shape
        out = linear_pallas(x.reshape(B * N, D), self.weight_bf16, self.bias)
        return out.reshape(B, N, -1)


class PreNorm:
    """Pallas equivalent of: nn.LayerNorm(dim) then fn(normed, **kwargs).
    If fn is a PallasLinear, the LayerNorm is fused into its matmul kernel."""

    def __init__(self, dim, fn):
        self.dim = dim
        self.fn = fn
        # nn.LayerNorm default init: weight=1, bias=0
        self.gamma = jnp.ones((dim,), dtype=jnp.float32)
        self.beta = jnp.zeros((dim,), dtype=jnp.float32)

    def __call__(self, x, **kwargs):
        B, N, D = x.shape
        assert D == self.dim
        x2d = x.reshape(B * N, D)
        if isinstance(self.fn, PallasLinear) and not kwargs:
            out = prenorm_linear_pallas(x2d, self.gamma, self.beta,
                                        self.fn.weight_bf16, self.fn.bias)
            return out.reshape(B, N, -1)
        normed = layernorm_pallas(x2d, self.gamma, self.beta).reshape(B, N, D)
        return self.fn(normed, **kwargs)


if __name__ == "__main__":
    key = jax.random.PRNGKey(0)
    B, N, D = 2, 8, 32  # batch, seq, hidden

    kx, kw, kb = jax.random.split(key, 3)
    x = jax.random.normal(kx, (B, N, D), dtype=jnp.float32)
    W = jax.random.normal(kw, (D, D), dtype=jnp.float32) * 0.02
    bias = jax.random.normal(kb, (D,), dtype=jnp.float32) * 0.01

    # Pure-JAX fp32 reference for the full PreNorm forward.
    mean = jnp.mean(x, axis=-1, keepdims=True)
    var = jnp.mean((x - mean) ** 2, axis=-1, keepdims=True)
    normed_ref = (x - mean) * lax.rsqrt(var + _EPS)  # gamma=1, beta=0
    ref = jnp.einsum("bnd,df->bnf", normed_ref, W) + bias

    # ---- fused path: PreNorm(dim, Linear) -> single Pallas kernel ----
    prenorm = PreNorm(D, PallasLinear(W, bias))
    out = prenorm(x)
    jax.block_until_ready(out)
    assert out.shape == (B, N, D)
    # bf16 MXU operands (fp32 accumulation) -> relaxed tolerance vs fp32 ref.
    assert jnp.allclose(out, ref, atol=1e-2, rtol=1e-2), \
        float(jnp.max(jnp.abs(out - ref)))

    # ---- generic-fn path: row-tiled LayerNorm kernel + arbitrary fn ----
    prenorm_gen = PreNorm(D, lambda z: jax.nn.gelu(z))
    out2 = prenorm_gen(x)
    jax.block_until_ready(out2)
    ref2 = jax.nn.gelu(normed_ref)
    assert jnp.allclose(out2, ref2, atol=2e-4, rtol=2e-4), \
        float(jnp.max(jnp.abs(out2 - ref2)))

    print("KERNEL_OK")
</pallas_src>

<mosaic_0001>
module attributes {stable_mosaic.version = 11 : i64} {
  func.func @_prenorm_linear_kernel(%arg0: i32, %arg1: i32, %arg2: memref<16x32xf32, #tpu.memory_space<vmem>>, %arg3: memref<1x32xf32, #tpu.memory_space<vmem>>, %arg4: memref<1x32xf32, #tpu.memory_space<vmem>>, %arg5: memref<32x32xbf16, #tpu.memory_space<vmem>>, %arg6: memref<1x32xf32, #tpu.memory_space<vmem>>, %arg7: memref<16x32xf32, #tpu.memory_space<vmem>>, %arg8: memref<16x32xbf16, #tpu.memory_space<vmem>>) attributes {dimension_semantics = [#tpu.dimension_semantics<parallel>, #tpu.dimension_semantics<arbitrary>], iteration_bounds = array<i64: 1, 1>, scalar_prefetch = 0 : i64, scratch_operands = 1 : i64, tpu.core_type = #tpu.core_type<tc>, window_params = [{transform_indices = @transform_0, window_bounds = array<i64: 16, 32>}, {pipeline_mode = #tpu.pipeline_mode<synchronous>, transform_indices = @transform_1, window_bounds = array<i64: 1, 32>}, {pipeline_mode = #tpu.pipeline_mode<synchronous>, transform_indices = @transform_2, window_bounds = array<i64: 1, 32>}, {transform_indices = @transform_3, window_bounds = array<i64: 32, 32>}, {transform_indices = @transform_4, window_bounds = array<i64: 1, 32>}, {transform_indices = @transform_5, window_bounds = array<i64: 16, 32>}]} {
    %c0_i32 = arith.constant 0 : i32
    %0 = arith.cmpi eq, %arg1, %c0_i32 : i32
    %1 = arith.extui %0 : i1 to i32
    %c0_i32_0 = arith.constant 0 : i32
    %2 = arith.cmpi ne, %1, %c0_i32_0 : i32
    scf.if %2 {
      %c0_8 = arith.constant 0 : index
      %c0_9 = arith.constant 0 : index
      %10 = vector.load %arg2[%c0_8, %c0_9] : memref<16x32xf32, #tpu.memory_space<vmem>>, vector<16x32xf32>
      %cst_10 = arith.constant dense<0.000000e+00> : vector<16xf32>
      %11 = vector.multi_reduction <add>, %10, %cst_10 [1] : vector<16x32xf32> to vector<16xf32>
      %12 = vector.shape_cast %11 : vector<16xf32> to vector<16x1xf32>
      %13 = arith.mulf %10, %10 : vector<16x32xf32>
      %cst_11 = arith.constant dense<0.000000e+00> : vector<16xf32>
      %14 = vector.multi_reduction <add>, %13, %cst_11 [1] : vector<16x32xf32> to vector<16xf32>
      %15 = vector.shape_cast %14 : vector<16xf32> to vector<16x1xf32>
      %cst_12 = arith.constant 3.125000e-02 : f32
      %16 = vector.broadcast %cst_12 : f32 to vector<16x1xf32>
      %17 = arith.mulf %12, %16 : vector<16x1xf32>
      %cst_13 = arith.constant 3.125000e-02 : f32
      %18 = vector.broadcast %cst_13 : f32 to vector<16x1xf32>
      %19 = arith.mulf %15, %18 : vector<16x1xf32>
      %20 = arith.mulf %17, %17 : vector<16x1xf32>
      %21 = arith.subf %19, %20 : vector<16x1xf32>
      %cst_14 = arith.constant 0.000000e+00 : f32
      %22 = vector.broadcast %cst_14 : f32 to vector<16x1xf32>
      %23 = arith.maximumf %21, %22 : vector<16x1xf32>
      %cst_15 = arith.constant 9.99999974E-6 : f32
      %24 = vector.broadcast %cst_15 : f32 to vector<16x1xf32>
      %25 = arith.addf %23, %24 : vector<16x1xf32>
      %26 = math.rsqrt %25 : vector<16x1xf32>
      %27 = vector.broadcast %17 : vector<16x1xf32> to vector<16x32xf32>
      %28 = arith.subf %10, %27 : vector<16x32xf32>
      %29 = vector.broadcast %26 : vector<16x1xf32> to vector<16x32xf32>
      %30 = arith.mulf %28, %29 : vector<16x32xf32>
      %c0_16 = arith.constant 0 : index
      %c0_17 = arith.constant 0 : index
      %31 = vector.load %arg3[%c0_16, %c0_17] : memref<1x32xf32, #tpu.memory_space<vmem>>, vector<1x32xf32>
      %32 = vector.broadcast %31 : vector<1x32xf32> to vector<16x32xf32>
      %33 = arith.mulf %30, %32 : vector<16x32xf32>
      %c0_18 = arith.constant 0 : index
      %c0_19 = arith.constant 0 : index
      %34 = vector.load %arg4[%c0_18, %c0_19] : memref<1x32xf32, #tpu.memory_space<vmem>>, vector<1x32xf32>
      %35 = vector.broadcast %34 : vector<1x32xf32> to vector<16x32xf32>
      %36 = arith.addf %33, %35 : vector<16x32xf32>
      %37 = arith.truncf %36 : vector<16x32xf32> to vector<16x32xbf16>
      %c0_20 = arith.constant 0 : index
      %c0_21 = arith.constant 0 : index
      %38 = vector.load %arg8[%c0_20, %c0_21] : memref<16x32xbf16, #tpu.memory_space<vmem>>, vector<16x32xbf16>
      tpu.vector_store %arg8[%c0_20, %c0_21], %37 {strides = array<i32>} : memref<16x32xbf16, #tpu.memory_space<vmem>>, vector<16x32xbf16>,
    } else {
    }
    %c0 = arith.constant 0 : index
    %c0_1 = arith.constant 0 : index
    %3 = vector.load %arg8[%c0, %c0_1] : memref<16x32xbf16, #tpu.memory_space<vmem>>, vector<16x32xbf16>
    %c0_2 = arith.constant 0 : index
    %c0_3 = arith.constant 0 : index
    %4 = vector.load %arg5[%c0_2, %c0_3] : memref<32x32xbf16, #tpu.memory_space<vmem>>, vector<32x32xbf16>
    %cst = arith.constant dense<0.000000e+00> : vector<16x32xf32>
    %5 = tpu.matmul %3, %4, %cst {dimension_numbers = #tpu.dot_dimension_numbers<[1], [0], [0], [1], [0, 0, 1, 1], [], []>} : vector<16x32xbf16>, vector<32x32xbf16>, vector<16x32xf32> -> vector<16x32xf32>
    %c0_4 = arith.constant 0 : index
    %c0_5 = arith.constant 0 : index
    %6 = vector.load %arg6[%c0_4, %c0_5] : memref<1x32xf32, #tpu.memory_space<vmem>>, vector<1x32xf32>
    %7 = vector.broadcast %6 : vector<1x32xf32> to vector<16x32xf32>
    %8 = arith.addf %5, %7 : vector<16x32xf32>
    %c0_6 = arith.constant 0 : index
    %c0_7 = arith.constant 0 : index
    %9 = vector.load %arg7[%c0_6, %c0_7] : memref<16x32xf32, #tpu.memory_space<vmem>>, vector<16x32xf32>
    tpu.vector_store %arg7[%c0_6, %c0_7], %8 {strides = array<i32>} : memref<16x32xf32, #tpu.memory_space<vmem>>, vector<16x32xf32>,
    return
  }
  func.func @transform_0(%arg0: i32, %arg1: i32) -> (i32, i32) {
    %c0_i32 = arith.constant 0 : i32
    %c0_i32_0 = arith.constant 0 : i32
    return %arg0, %c0_i32 : i32, i32
  }
  func.func @transform_1(%arg0: i32, %arg1: i32) -> (i32, i32) {
    %c0_i32 = arith.constant 0 : i32
    %c0_i32_0 = arith.constant 0 : i32
    %c0_i32_1 = arith.constant 0 : i32
    return %c0_i32, %c0_i32_0 : i32, i32
  }
  func.func @transform_2(%arg0: i32, %arg1: i32) -> (i32, i32) {
    %c0_i32 = arith.constant 0 : i32
    %c0_i32_0 = arith.constant 0 : i32
    %c0_i32_1 = arith.constant 0 : i32
    return %c0_i32, %c0_i32_0 : i32, i32
  }
  func.func @transform_3(%arg0: i32, %arg1: i32) -> (i32, i32) {
    %c0_i32 = arith.constant 0 : i32
    %c0_i32_0 = arith.constant 0 : i32
    return %c0_i32, %arg1 : i32, i32
  }
  func.func @transform_4(%arg0: i32, %arg1: i32) -> (i32, i32) {
    %c0_i32 = arith.constant 0 : i32
    %c0_i32_0 = arith.constant 0 : i32
    return %c0_i32, %arg1 : i32, i32
  }
  func.func @transform_5(%arg0: i32, %arg1: i32) -> (i32, i32) {
    %c0_i32 = arith.constant 0 : i32
    return %arg0, %arg1 : i32, i32
  }
}

</mosaic_0001>

<bundles_post_ra>
// kernel: tpu_custom_call.1
= control target key start
LH: loop header
LB: loop body
LE: loop exit
PB: predicated region body
PF: predicated region fallthrough
CT: control target
= control target key end

     0   :  { %10 = vsyncpa [#allocation4], 0  ;;  %s410_s0 = inlined_call_operand.hbm [shape: f32[16,32], index: 0, kind: input, shape index: {}]   ;;  %s411_s1 = inlined_call_operand.hbm [shape: f32[1,32], index: 1, kind: input, shape index: {}]   ;;  %s412_s2 = inlined_call_operand.vmem [shape: f32[1,32], index: 2, kind: input, shape index: {}]   ;;  %s413_s3 = inlined_call_operand.hbm [shape: bf16[32,32], index: 3, kind: input, shape index: {}]   ;;  %s414_s4 = inlined_call_operand.vmem [shape: f32[1,32], index: 4, kind: input, shape index: {}]   ;;  %s415_s5 = inlined_call_operand.hbm [shape: f32[16,32], index: 5, kind: output, shape index: {}]  }
   0x1   :  { %11 = vsyncpa [#allocation7], 0  ;;  %s31_s20 = sshll.u32 %s411_s1, 4  ;;  %s32_s20 = int_to_ptr.hbm [resolvable:$true] %s31_s20 }
   0x2   :  { %12 = vsyncpa [#allocation5], 0  ;;  %s341_s21 = smov [#allocation6]   ;;  %s17_s25 = sshll.u32 %s410_s0, 4  ;;  %s18_s25 = int_to_ptr.hbm [resolvable:$true] %s17_s25 }
   0x3   :  { %s33_s22 = sshll.u32 %s341_s21, 4  ;;  %s342_s26 = smov [#allocation3]   ;;  %s34_s22 = int_to_ptr.vmem [resolvable:$true] %s33_s22 }
   0x4   :  { %36 = dma.hbm_to_vmem [thread:$0]  %s32_s20, 16, %s34_s22, [#allocation7]  }
   0x5   :  { %s19_s27 = sshll.u32 %s342_s26, 4  ;;  %s343_s28 = smov 128   ;;  %s20_s27 = int_to_ptr.vmem [resolvable:$true] %s19_s27 }
   0x6   :  { %s344_s29 = smov 8   ;;  %s43_s6 = sshll.u32 %s413_s3, 4  ;;  %s44_s6 = int_to_ptr.hbm [resolvable:$true] %s43_s6 }
   0x7   :  { %25 = dma.hbm_to_vmem [thread:$0]  %s18_s25, 256, %s20_s27, [#allocation4], %s343_s28, %s343_s28, %s344_s29  }
   0x8   :  { %s345_s7 = smov [#allocation8]   ;;  %s346_s0 = smov 64  }
   0x9   :  { %s45_s8 = sshll.u32 %s345_s7, 4  ;;  %s347_s9 = smov 4   ;;  %s46_s8 = int_to_ptr.vmem [resolvable:$true] %s45_s8 }
   0xa   :  { %51 = dma.hbm_to_vmem [thread:$0]  %s44_s6, 256, %s46_s8, [#allocation7], %s346_s0, %s346_s0, %s347_s9  }
   0xb   :  { %335 = dma.done.wait [#allocation4], 256  }
   0xc   :  { %336 = vsyncadd [#allocation4], 4294967040 }
   0xd   :  { %337 = dma.done.wait [#allocation7], 272  }
   0xe   :  { %338 = vsyncadd [#allocation7], 4294967024  ;;  %vm73_vm0 = vcmask 261120   ;;  %v71_v0 = vld [vmem:[#allocation3] sm:$0xff]  ;;  %v72_v3 = vld [vmem:[#allocation3 + $0x8] sm:$0xff]  ;;  %vm138_vm5 = vcmask 257024  }
   0xf   :  { %v74_v1 = vsel %vm73_vm0, %v71_v0, 0.0  ;;  %v80_v2 = vmul.f32 %v71_v0, %v71_v0  ;;  %v81_v5 = vmul.f32 %v72_v3, %v72_v3  ;;  %v77_v6 = vsel %vm73_vm0, %v72_v3, 0.0  ;;  %v223_v22 = vld [vmem:[#allocation8 + $0x8] sm:$0xff]  ;;  %v222_v24 = vld [vmem:[#allocation8] sm:$0xff]  ;;  %v232_v34 = vld [vmem:[#allocation6] ss:$0 sm:$0xff] }
  0x10   :  { %75 = vadd.xlane.f32.xlu0 %v74_v1  ;;  %178 = vmatpush.bf16.msra.mxu0 %v223_v22  ;;  %v233_v37 = vld [vmem:[%s412_s2] ss:$0 sm:$0xff]  ;;  %s348_s12 = smov [#allocation9]   ;;  %s194_s16 = sshll.u32 %s415_s5, 4  ;;  %s195_s16 = int_to_ptr.hbm [resolvable:$true] %s194_s16 }
  0x11   :  { %v82_v4 = vsel %vm73_vm0, %v80_v2, 0.0  ;;  %v85_v7 = vsel %vm73_vm0, %v81_v5, 0.0  ;;  %v234_v53 = vld [vmem:[%s414_s4] ss:$0 sm:$0xff]  ;;  %s192_s13 = sshll.u32 %s348_s12, 4  ;;  %s193_s13 = int_to_ptr.vmem [resolvable:$true] %s192_s13 }
  0x12   :  { %83 = vadd.xlane.f32.xlu1 %v82_v4 }
  0x14   :  { %179 = vmatpush.bf16.msra.mxu0 %v222_v24 }
  0x18   :  { %78 = vadd.xlane.f32.xlu0 %v77_v6 }
  0x1a   :  { %86 = vadd.xlane.f32.xlu1 %v85_v7 }
  0x83   :  { %v76_v8 = vpop.xlane.xlu0 %75 }
  0x84   :  { %v88_v9 = vmul.f32 0.03125, %v76_v8 }
  0x85   :  { %v84_v10 = vpop.xlane.xlu1 %83 }
  0x86   :  { %v92_v11 = vmul.f32 %v88_v9, %v88_v9  ;;  %v90_v12 = vmul.f32 0.03125, %v84_v10  ;;  %v120_v33 = vsub.f32 %v71_v0, %v88_v9 }
  0x88   :  { %v94_v13 = vsub.f32 %v90_v12, %v92_v11 }
  0x8a   :  { %v96_v14 = vmax.f32 %v94_v13, 0.0 }
  0x8b   :  { %v79_v15 = vpop.xlane.xlu0 %78 }
  0x8c   :  { %v98_v16 = vadd.f32 1e-05, %v96_v14  ;;  %v89_v17 = vmul.f32 0.03125, %v79_v15 }
  0x8d   :  { %v87_v18 = vpop.xlane.xlu1 %86 }
  0x8e   :  { %235 = vrsqrt.f32 %v98_v16  ;;  %v93_v19 = vmul.f32 %v89_v17, %v89_v17  ;;  %v91_v20 = vmul.f32 0.03125, %v87_v18  ;;  %vm106_vm2 = vweird.f32 %v98_v16 }
  0x8f   :  { %v121_v46 = vsub.f32 %v72_v3, %v89_v17 }
  0x90   :  { %v95_v21 = vsub.f32 %v91_v20, %v93_v19 }
  0x92   :  { %v97_v23 = vmax.f32 %v95_v21, 0.0 }
  0x94   :  { %v236_v25 = vpop.eup %235  ;;  %v99_v27 = vadd.f32 1e-05, %v97_v23 }
  0x95   :  { %v101_v26 = vmul.f32 %v236_v25, %v98_v16  ;;  %vm107_vm1 = vweird.f32 %v236_v25 }
  0x96   :  { %237 = vrsqrt.f32 %v99_v27  ;;  %vm108_vm3 = vmor %vm106_vm2, %vm107_vm1  ;;  %vm116_vm6 = vweird.f32 %v99_v27 }
  0x97   :  { %v102_v28 = vmul.f32 %v236_v25, %v101_v26 }
  0x99   :  { %v103_v29 = vmul.f32 0.5, %v102_v28 }
  0x9b   :  { %v104_v30 = vsub.f32 1.5, %v103_v29 }
  0x9c   :  { %v238_v31 = vpop.eup %237 }
  0x9d   :  { %v105_v32 = vmul.f32 %v236_v25, %v104_v30  ;;  %v111_v35 = vmul.f32 %v238_v31, %v99_v27  ;;  %vm117_vm4 = vweird.f32 %v238_v31 }
  0x9e   :  { %vm118_vm7 = vmor %vm116_vm6, %vm117_vm4 }
  0x9f   :  { %v109_v36 = vsel %vm108_vm3, %v236_v25, %v105_v32  ;;  %v112_v39 = vmul.f32 %v238_v31, %v111_v35 }
  0xa0   :  { %v122_v38 = vmul.f32 %v120_v33, %v109_v36 }
  0xa1   :  { %v113_v41 = vmul.f32 0.5, %v112_v39 }
  0xa2   :  { %v128_v40 = vmul.f32 %v232_v34, %v122_v38 }
  0xa3   :  { %v114_v43 = vsub.f32 1.5, %v113_v41 }
  0xa4   :  { %v134_v42 = vadd.f32 %v233_v37, %v128_v40 }
  0xa5   :  { %v115_v45 = vmul.f32 %v238_v31, %v114_v43 }
  0xa6   :  { %v136_v44 = vpack.c.bf16 %v134_v42, %v134_v42 }
  0xa7   :  { %v119_v47 = vsel %vm118_vm7, %v238_v31, %v115_v45 }
  0xa8   :  { %139 = vst.msk [vmem:[#allocation2] sm:$0xf] %vm138_vm5, %v136_v44  ;;  %v123_v48 = vmul.f32 %v121_v46, %v119_v47 }
  0xaa   :  { %v129_v49 = vmul.f32 %v232_v34, %v123_v48 }
  0xac   :  { %v135_v50 = vadd.f32 %v233_v37, %v129_v49 }
  0xae   :  { %v137_v51 = vpack.c.bf16 %v135_v50, %v135_v50 }
  0xb0   :  { %140 = vst.msk [vmem:[#allocation2 + $0x4] sm:$0xf] %vm138_vm5, %v137_v51 }
  0xb7   :  { %v221_v52 = vld [vmem:[#allocation2] sm:$0xff] }
  0xb8   :  { %220 = vmatmul.msk.bf16.vlgmr.msra.gmra.mxu0 %vm73_vm0, %v221_v52 }
 0x135   :  { %v181_v54 = vpop.f32.mrf.mxu0 }
 0x136   :  { %v182_v55 = vadd.f32 %v234_v53, %v181_v54 }
 0x138   :  { %186 = vst.msk [vmem:[#allocation9] sm:$0xff] %vm73_vm0, %v182_v55 }
 0x13d   :  { %v183_v56 = vpop.f32.mrf.mxu0 }
 0x13e   :  { %v184_v57 = vadd.f32 %v234_v53, %v183_v56 }
 0x140   :  { %187 = vst.msk [vmem:[#allocation9 + $0x8] sm:$0xff] %vm73_vm0, %v184_v57 }
 0x141   :  { %200 = dma.vmem_to_hbm [thread:$0]  %s193_s13, 256, %s195_s16, [#allocation5], %s343_s28, %s343_s28, %s344_s29  }
 0x142   :  { %339 = dma.done.wait [#allocation5], 256  }
 0x143   :  { %340 = vsyncadd [#allocation5], 4294967040 }
 0x144   :  { %205 = vsyncpa [#allocation4], 1 }
 0x145   :  { %206 = vsyncpa [#allocation7], 1 }
 0x146   :  { %207 = vsyncpa [#allocation5], 1 }

</bundles_post_ra>
